<compile_context>
chip_gen: v6e
topology: v6e:2x2x1
jax: 0.10.0
libtpu: 0.0.40
codegen_flags: <defaults>
</compile_context>

<pallas_src>
import jax
import jax.numpy as jnp
from jax.experimental import pallas as pl
from jax.experimental.pallas import tpu as pltpu


def _patch_embed_kernel(patches_ref, w_ref, b_ref, out_ref):
    # patches_ref: (TM, K) streaming dtype; w_ref: (K, E) f32 (VMEM-resident);
    # b_ref: (1, E) f32; out_ref: (TM, E) streaming dtype.
    #
    # NOTE (ragged tail): when TM does not divide M, the padded rows of the
    # edge block hold unspecified data.  That is safe here because every op
    # is row-independent and Pallas drops the padded rows on writeback.  Do
    # NOT add any cross-row reduction (e.g. a fused norm) without masking
    # those rows first.
    acc = jnp.dot(patches_ref[...].astype(jnp.float32), w_ref[...],
                  preferred_element_type=jnp.float32)
    out_ref[...] = (acc + b_ref[...]).astype(out_ref.dtype)


def _round_up(v, q):
    return -(-v // q) * q


def _largest_divisor(m, cap, quantum):
    """Largest divisor of m that is <= cap and a multiple of quantum (0 if none)."""
    best = 0
    i = 1
    while i * i <= m:
        if m % i == 0:
            for d in (i, m // i):
                if d <= cap and d % quantum == 0 and d > best:
                    best = d
        i += 1
    return best


def _pick_tile_m(M, sublane, row_bytes_db, *, vmem_budget_bytes=20 << 20,
                 max_tm=16384, min_tm=512, target_steps=8):
    """Pick the M-axis tile.

    The op is HBM-bound (~2 FLOP/byte), so the ~0.35us fixed cost per grid
    step must be amortised against pure DMA time:
      * as large as possible, up to max_tm rows AND a double-buffered
        streaming footprint of vmem_budget_bytes (byte-based cap, so large E
        or f32 streams shrink TM automatically -- required for v7x's 64 MiB
        physical VMEM),
      * a multiple of the dtype sublane quantum,
      * preferably an exact divisor of M (no ragged tail block),
      * small enough to keep ~target_steps steps so the pipeline has work in
        flight and both v7x TensorCores get steps.
    """
    if M <= min_tm:
        # Full-extent block on the M axis: single step, no padding, always a
        # legal block shape.
        return M
    budget_rows = max(sublane,
                      (vmem_budget_bytes // row_bytes_db) // sublane * sublane)
    cap = min(max_tm, _round_up(-(-M // target_steps), sublane))
    cap = max(cap, min_tm)
    cap = min(cap, budget_rows)
    cap = max(cap, sublane)
    # Prefer an exact divisor within 2x of the cap: a ragged tail wastes one
    # step's DMA/MXU on masked rows, so avoid it whenever a divisor exists.
    best = _largest_divisor(M, cap, sublane)
    if best * 2 >= cap:
        return best
    return cap          # ragged tail block; Pallas masks the edge


def patch_embed(x, weight, bias, patch_size=4):
    """Swin PatchEmbed forward (norm_layer=None -> nn.Identity).

    x:      [B, C, H, W]   (NCHW, like PyTorch)
    weight: [E, C, p, p]   (nn.Conv2d weight)
    bias:   [E]
    Returns (tokens [B, Hp*Wp, E], Hp, Wp).
    """
    B, C, H, W = x.shape
    p = patch_size
    E = weight.shape[0]

    # F.pad(x, (0, pad_w, 0, pad_h, 0, 0)) equivalent (pad right/bottom only).
    pad_h = (-H) % p
    pad_w = (-W) % p
    if pad_h or pad_w:
        x = jnp.pad(x, ((0, 0), (0, 0), (0, pad_h), (0, pad_w)))
    H2, W2 = H + pad_h, W + pad_w
    Hp, Wp = H2 // p, W2 // p

    # One fused XLA pass: NCHW -> [M, K] patch matrix, features ordered
    # (c, kh, kw) to match the Conv2d weight flattening.  (See TODO(synk) at
    # the top of the file about fusing this into the kernel.)
    xr = x.reshape(B, C, Hp, p, Wp, p).transpose(0, 2, 4, 1, 3, 5)
    patches = xr.reshape(B * Hp * Wp, C * p * p)          # [M, K]
    M, K = patches.shape

    # Weight / bias stay float32 regardless of the streaming dtype: VMEM
    # resident and tiny, so zero extra HBM bandwidth, full f32 accuracy.
    wmat = weight.reshape(E, K).T.astype(jnp.float32)      # [K, E]
    brow = bias.astype(jnp.float32).reshape(1, E)          # [1, E]

    itemsize = jnp.dtype(x.dtype).itemsize
    sublane = 8 * max(1, 4 // itemsize)        # 8 rows for f32, 16 for bf16
    row_bytes_db = 2 * (K + E) * itemsize      # double-buffered in+out per row
    TM = _pick_tile_m(M, sublane, row_bytes_db)
    grid = pl.cdiv(M, TM)                      # ragged tail (if any) is masked

    # Explicit VMEM budget: streamed tiles can exceed v5e's 16 MiB scoped
    # default at large TM; stay well under v7x's 32 MiB default / 64 MiB phys.
    stream_bytes = 2 * TM * (K + E) * itemsize + 2 * (K * E + E) * 4
    vmem_limit = int(min(max(stream_bytes + (4 << 20), 16 << 20), 30 << 20))

    out = pl.pallas_call(
        _patch_embed_kernel,
        out_shape=jax.ShapeDtypeStruct((M, E), x.dtype),
        grid_spec=pltpu.PrefetchScalarGridSpec(
            num_scalar_prefetch=0,
            grid=(grid,),
            in_specs=[
                pl.BlockSpec((TM, K), lambda i: (i, 0)),
                # Constant index_maps: fetched once, stay VMEM-resident.
                pl.BlockSpec((K, E), lambda i: (0, 0)),
                pl.BlockSpec((1, E), lambda i: (0, 0)),
            ],
            out_specs=pl.BlockSpec((TM, E), lambda i: (i, 0)),
        ),
        compiler_params=pltpu.CompilerParams(
            dimension_semantics=("parallel",),
            vmem_limit_bytes=vmem_limit),
        cost_estimate=pl.CostEstimate(
            flops=2 * M * K * E,
            transcendentals=0,
            bytes_accessed=(M * K * itemsize + M * E * itemsize
                            + (K * E + E) * 4)),
    )(patches, wmat, brow)

    tokens = out.reshape(B, Hp * Wp, E)   # free view: M == B*Hp*Wp
    # norm_layer=None in the reference module -> nn.Identity(), nothing to do.
    return tokens, Hp, Wp


def _reference(x, weight, bias, patch_size):
    """PyTorch-equivalent reference via lax conv (f32)."""
    p = patch_size
    B, C, H, W = x.shape
    E = weight.shape[0]
    pad_h = (-H) % p
    pad_w = (-W) % p
    if pad_h or pad_w:
        x = jnp.pad(x, ((0, 0), (0, 0), (0, pad_h), (0, pad_w)))
    out = jax.lax.conv_general_dilated(
        x.astype(jnp.float32), weight.astype(jnp.float32),
        window_strides=(p, p), padding="VALID",
        dimension_numbers=("NCHW", "OIHW", "NCHW"))
    out = out + bias.astype(jnp.float32).reshape(1, E, 1, 1)
    Hp, Wp = out.shape[2], out.shape[3]
    return out.reshape(B, E, Hp * Wp).transpose(0, 2, 1), Hp, Wp


if __name__ == "__main__":
    # Small shapes consistent with the module: patch_size=4, in_c=3,
    # embed_dim=32, batch=2.
    patch_size = 4
    in_c = 3
    embed_dim = 32
    B = 2

    key = jax.random.PRNGKey(0)
    kx1, kx2, kx3, kx4, kw, kb = jax.random.split(key, 6)
    weight = jax.random.normal(
        kw, (embed_dim, in_c, patch_size, patch_size), jnp.float32) * 0.02
    bias = jax.random.normal(kb, (embed_dim,), jnp.float32) * 0.02

    # Case 1: f32, H/W divisible by patch_size (no pad path, M = 32,
    # single full-extent block).
    x1 = jax.random.normal(kx1, (B, in_c, 16, 16), jnp.float32)
    t1, Hp1, Wp1 = patch_embed(x1, weight, bias, patch_size)
    t1 = jax.block_until_ready(t1)
    r1, Hr1, Wr1 = _reference(x1, weight, bias, patch_size)
    assert t1.shape == (B, Hp1 * Wp1, embed_dim)
    assert (Hp1, Wp1) == (Hr1, Wr1)
    assert jnp.allclose(t1, r1, atol=1e-4, rtol=1e-4)

    # Case 2: f32, H/W NOT divisible by patch_size (pad path, M = 2*5*5 = 50,
    # full-extent non-multiple-of-8 M block).
    x2 = jax.random.normal(kx2, (B, in_c, 17, 17), jnp.float32)
    t2, Hp2, Wp2 = patch_embed(x2, weight, bias, patch_size)
    t2 = jax.block_until_ready(t2)
    r2, Hr2, Wr2 = _reference(x2, weight, bias, patch_size)
    assert (Hp2, Wp2) == (Hr2, Wr2) == (5, 5)
    assert jnp.allclose(t2, r2, atol=1e-4, rtol=1e-4)

    # Case 3: bf16 streams with f32-resident weight/bias and f32 accumulation.
    t3, Hp3, Wp3 = patch_embed(x1.astype(jnp.bfloat16),
                               weight.astype(jnp.bfloat16),
                               bias.astype(jnp.bfloat16), patch_size)
    t3 = jax.block_until_ready(t3)
    assert t3.dtype == jnp.bfloat16
    assert jnp.allclose(t3.astype(jnp.float32), r1, atol=5e-2, rtol=5e-2)

    # Case 4: multi-step grid with an exact-divisor tile
    # (M = 2*24*24 = 1152 -> TM = 384, grid = 3, no ragged tail).
    x4 = jax.random.normal(kx3, (B, in_c, 96, 96), jnp.float32)
    t4, Hp4, Wp4 = patch_embed(x4, weight, bias, patch_size)
    t4 = jax.block_until_ready(t4)
    r4, Hr4, Wr4 = _reference(x4, weight, bias, patch_size)
    assert (Hp4, Wp4) == (Hr4, Wr4) == (24, 24)
    assert jnp.allclose(t4, r4, atol=1e-4, rtol=1e-4)

    # Case 5: prime-ish M with no usable divisor -> ragged masked tail block
    # (M = 2*17*17 = 578 -> TM = 512, grid = 2).
    x5 = jax.random.normal(kx4, (B, in_c, 68, 68), jnp.float32)
    t5, Hp5, Wp5 = patch_embed(x5, weight, bias, patch_size)
    t5 = jax.block_until_ready(t5)
    r5, Hr5, Wr5 = _reference(x5, weight, bias, patch_size)
    assert (Hp5, Wp5) == (Hr5, Wr5) == (17, 17)
    assert jnp.allclose(t5, r5, atol=1e-4, rtol=1e-4)

    print("KERNEL_OK")
</pallas_src>

<mosaic_0001>
module attributes {stable_mosaic.version = 11 : i64} {
  func.func @_patch_embed_kernel(%arg0: i32, %arg1: memref<32x48xf32, #tpu.memory_space<vmem>>, %arg2: memref<48x32xf32, #tpu.memory_space<vmem>>, %arg3: memref<1x32xf32, #tpu.memory_space<vmem>>, %arg4: memref<32x32xf32, #tpu.memory_space<vmem>>) attributes {dimension_semantics = [#tpu.dimension_semantics<parallel>], iteration_bounds = array<i64: 1>, scalar_prefetch = 0 : i64, scratch_operands = 0 : i64, tpu.core_type = #tpu.core_type<tc>, window_params = [{transform_indices = @transform_0, window_bounds = array<i64: 32, 48>}, {pipeline_mode = #tpu.pipeline_mode<synchronous>, transform_indices = @transform_1, window_bounds = array<i64: 48, 32>}, {pipeline_mode = #tpu.pipeline_mode<synchronous>, transform_indices = @transform_2, window_bounds = array<i64: 1, 32>}, {transform_indices = @transform_3, window_bounds = array<i64: 32, 32>}]} {
    %c0 = arith.constant 0 : index
    %c0_0 = arith.constant 0 : index
    %0 = vector.load %arg1[%c0, %c0_0] : memref<32x48xf32, #tpu.memory_space<vmem>>, vector<32x48xf32>
    %c0_1 = arith.constant 0 : index
    %c0_2 = arith.constant 0 : index
    %1 = vector.load %arg2[%c0_1, %c0_2] : memref<48x32xf32, #tpu.memory_space<vmem>>, vector<48x32xf32>
    %cst = arith.constant dense<0.000000e+00> : vector<32x32xf32>
    %2 = tpu.matmul %0, %1, %cst {dimension_numbers = #tpu.dot_dimension_numbers<[1], [0], [0], [1], [0, 0, 1, 1], [], []>} : vector<32x48xf32>, vector<48x32xf32>, vector<32x32xf32> -> vector<32x32xf32>
    %c0_3 = arith.constant 0 : index
    %c0_4 = arith.constant 0 : index
    %3 = vector.load %arg3[%c0_3, %c0_4] : memref<1x32xf32, #tpu.memory_space<vmem>>, vector<1x32xf32>
    %4 = vector.broadcast %3 : vector<1x32xf32> to vector<32x32xf32>
    %5 = arith.addf %2, %4 : vector<32x32xf32>
    %c0_5 = arith.constant 0 : index
    %c0_6 = arith.constant 0 : index
    %6 = vector.load %arg4[%c0_5, %c0_6] : memref<32x32xf32, #tpu.memory_space<vmem>>, vector<32x32xf32>
    tpu.vector_store %arg4[%c0_5, %c0_6], %5 {strides = array<i32>} : memref<32x32xf32, #tpu.memory_space<vmem>>, vector<32x32xf32>,
    return
  }
  func.func @transform_0(%arg0: i32) -> (i32, i32) {
    %c0_i32 = arith.constant 0 : i32
    %c0_i32_0 = arith.constant 0 : i32
    return %arg0, %c0_i32 : i32, i32
  }
  func.func @transform_1(%arg0: i32) -> (i32, i32) {
    %c0_i32 = arith.constant 0 : i32
    %c0_i32_0 = arith.constant 0 : i32
    %c0_i32_1 = arith.constant 0 : i32
    return %c0_i32, %c0_i32_0 : i32, i32
  }
  func.func @transform_2(%arg0: i32) -> (i32, i32) {
    %c0_i32 = arith.constant 0 : i32
    %c0_i32_0 = arith.constant 0 : i32
    %c0_i32_1 = arith.constant 0 : i32
    return %c0_i32, %c0_i32_0 : i32, i32
  }
  func.func @transform_3(%arg0: i32) -> (i32, i32) {
    %c0_i32 = arith.constant 0 : i32
    %c0_i32_0 = arith.constant 0 : i32
    return %arg0, %c0_i32 : i32, i32
  }
}

</mosaic_0001>

<bundles_post_ra>
// kernel: tpu_custom_call.1
= control target key start
LH: loop header
LB: loop body
LE: loop exit
PB: predicated region body
PF: predicated region fallthrough
CT: control target
= control target key end

     0   :  { %s280_s0 = inlined_call_operand.vmem [shape: f32[32,48], index: 0, kind: input, shape index: {}]   ;;  %s281_s1 = inlined_call_operand.vmem [shape: f32[48,32], index: 1, kind: input, shape index: {}]   ;;  %s282_s2 = inlined_call_operand.vmem [shape: f32[1,32], index: 2, kind: input, shape index: {}]   ;;  %s283_s3 = inlined_call_operand.hbm [shape: f32[32,32], index: 3, kind: output, shape index: {}]  }
   0x1   :  { %v24_v0 = vld [vmem:[%s281_s1 + $0x28] sm:$0xff]  ;;  %v23_v1 = vld [vmem:[%s281_s1 + $0x20] sm:$0xff]  ;;  %v22_v2 = vld [vmem:[%s281_s1 + $0x18] sm:$0xff] }
   0x2   :  { %166 = vmatprep.subr.mxu0 %v24_v0  ;;  %184 = vmatprep.subr.mxu1 %v24_v0 }
   0x3   :  { %167 = vmatpush3.msra.mxu0 %v24_v0  ;;  %190 = vmatpush3.msra.mxu1 %v24_v0 }
   0x4   :  { %168 = vmatprep.subr.mxu0 %v23_v1  ;;  %185 = vmatprep.subr.mxu1 %v23_v1 }
   0x5   :  { %8 = vsyncpa [#allocation3], 0  ;;  %169 = vmatpush3.msra.mxu0 %v23_v1  ;;  %191 = vmatpush3.msra.mxu1 %v23_v1  ;;  %v21_v3 = vld [vmem:[%s281_s1 + $0x10] sm:$0xff]  ;;  %v20_v4 = vld [vmem:[%s281_s1 + $0x8] sm:$0xff]  ;;  %vm32_vm0 = vcmask 392192   ;;  %s221_s6 = smov [#allocation2]  }
   0x6   :  { %170 = vmatprep.subr.mxu0 %v22_v2  ;;  %186 = vmatprep.subr.mxu1 %v22_v2  ;;  %v19_v5 = vld [vmem:[%s281_s1] sm:$0xff]  ;;  %v17_v7 = vld [vmem:[%s280_s0 + $0x10] sm:$0xff]  ;;  %v16_v8 = vld [vmem:[%s280_s0 + $0x8] sm:$0xff]  ;;  %s140_s7 = sshll.u32 %s221_s6, 4  ;;  %vm130_vm1 = vcmask 261120   ;;  %s141_s7 = int_to_ptr.vmem [resolvable:$true] %s140_s7 }
   0x7   :  { %171 = vmatpush3.msra.mxu0 %v22_v2  ;;  %192 = vmatpush3.msra.mxu1 %v22_v2  ;;  %v15_v6 = vld [vmem:[%s280_s0] sm:$0xff]  ;;  %v18_v9 = vld [vmem:[%s280_s0 + $0x18] sm:$0xff]  ;;  %s199_s0 = scalar_lea.vmem %s141_s7, 512  ;;  %p204_p1 = scmp.lt.s32.totalorder %s141_s7, %s141_s7 }
   0x8   :  { %172 = vmatprep.subr.mxu0 %v21_v3  ;;  %187 = vmatprep.subr.mxu1 %v21_v3  ;;  %v151_v10 = vld [vmem:[%s282_s2] ss:$0 sm:$0xff]  ;;  %p200_p0 = scmp.ne.s32.totalorder %s141_s7, %s199_s0  ;;  %p205_p2 = scmp.lt.s32.totalorder %s199_s0, %s199_s0 }
   0x9   :  { %173 = vmatpush3.msra.mxu0 %v21_v3  ;;  %193 = vmatpush3.msra.mxu1 %v21_v3 }
   0xa   :  { %174 = vmatprep.subr.mxu0 %v20_v4  ;;  %188 = vmatprep.subr.mxu1 %v20_v4  ;;  %p206_p3 = por %p205_p2, %p204_p1 }
   0xb   :  { %175 = vmatpush3.msra.mxu0 %v20_v4  ;;  %194 = vmatpush3.msra.mxu1 %v20_v4 }
   0xc   :  { %176 = vmatprep.subr.mxu0 %v19_v5  ;;  %189 = vmatprep.subr.mxu1 %v19_v5  ;;  %p207_p4 = pnand %p206_p3, %p200_p0 }
   0xd   :  { %177 = vmatpush3.msra.mxu0 %v19_v5  ;;  %195 = vmatpush3.msra.mxu1 %v19_v5 }
   0xe   :  { %178 = vmatprep.mubr.msk.f32.mxu0 %vm32_vm0, %v15_v6  ;;  %181 = vmatprep.mubr.msk.f32.mxu1 %vm32_vm0, %v17_v7 }
   0xf   :  { %179 = vmatmul.mubr.msk.f32.vlgmr.msra.gmra.mxu0 %vm32_vm0, %v16_v8  ;;  %182 = vmatmul.mubr.msk.f32.vlgmr.msra.gmra.mxu1 %vm32_vm0, %v18_v9 }
  0xcf   :  { %v180_v11 = vpop.f32.mrf.mxu0  ;;  %v183_v12 = vpop.f32.mrf.mxu1 }
  0xd0   :  { %v117_v13 = vadd.f32 %v180_v11, %v151_v10  ;;  %v127_v14 = vadd.f32 %v183_v12, %v151_v10 }
  0xd1   :  { %v111_v15 = vpop.f32.mrf.mxu0  ;;  %v121_v16 = vpop.f32.mrf.mxu1 }
  0xd2   :  { %132 = vst.msk [vmem:[#allocation2 + $0x8] sm:$0xff] %vm130_vm1, %v117_v13  ;;  %134 = vst.msk [vmem:[#allocation2 + $0x18] sm:$0xff] %vm130_vm1, %v127_v14  ;;  %v112_v17 = vadd.f32 %v151_v10, %v111_v15  ;;  %v122_v18 = vadd.f32 %v151_v10, %v121_v16 }
  0xd4   :  { %131 = vst.msk [vmem:[#allocation2] sm:$0xff] %vm130_vm1, %v112_v17  ;;  %133 = vst.msk [vmem:[#allocation2 + $0x10] sm:$0xff] %vm130_vm1, %v122_v18 }
  0xd5   :  { %210 = shalt.err (!%p207_p4)
}
  0xd6   :  { %s222_s2 = smov 128   ;;  %s223_s8 = smov 8  }
  0xd7   :  { %146 = dma.vmem_to_hbm [thread:$0]  %s141_s7, 512, %s283_s3, [#allocation3], %s222_s2, %s222_s2, %s223_s8  }
  0xd8   :  { %219 = dma.done.wait [#allocation3], 512  }
  0xd9   :  { %220 = vsyncadd [#allocation3], 4294966784 }
  0xda   :  { %150 = vsyncpa [#allocation3], 1 }

</bundles_post_ra>
